<compile_context>
chip_gen: v7x
topology: tpu7x:2x2x1
jax: 0.10.0
libtpu: 0.0.40
codegen_flags: <defaults>
</compile_context>

<pallas_src>
import functools

import jax
import jax.numpy as jnp
from jax.experimental import pallas as pl
from jax.experimental.pallas import tpu as pltpu

EPS = 1e-5     # BatchNorm1d default eps
LANE = 128


def _round_up(x, m):
    return (x + m - 1) // m * m


# ----------------------------------------------------------------------------
# Pallas kernels
# ----------------------------------------------------------------------------
def _mlp_max_kernel(*refs, n_layers, has_transform):
    """Fused [x @ T] -> (matmul+bias+relu)*n -> max over points.

    Grid = (B, N_chunks).  The (1,1,Cout) output block is resident across the
    inner (arbitrary) N axis and accumulated with elementwise jnp.maximum.
    """
    i = 0
    x_ref = refs[i]; i += 1
    t_ref = None
    if has_transform:
        t_ref = refs[i]; i += 1
    wb = refs[i:i + 2 * n_layers]; i += 2 * n_layers
    o_ref = refs[i]

    h = x_ref[0]                                              # (TN, Cin) bf16
    if has_transform:
        h = jnp.dot(h, t_ref[0], preferred_element_type=jnp.float32)
        h = h.astype(jnp.bfloat16)
    for l in range(n_layers):
        w = wb[2 * l][...]                                    # (Cin, Cout) bf16
        b = wb[2 * l + 1][...]                                # (1, Cout) f32
        h = jnp.dot(h, w, preferred_element_type=jnp.float32) + b
        h = jnp.maximum(h, 0.0)
        if l < n_layers - 1:
            h = h.astype(jnp.bfloat16)

    chunk_max = jnp.max(h, axis=0, keepdims=True)             # (1, Cout) f32
    n_idx = pl.program_id(1)

    @pl.when(n_idx == 0)
    def _():
        o_ref[0] = chunk_max

    @pl.when(n_idx > 0)
    def _():
        o_ref[0] = jnp.maximum(o_ref[0], chunk_max)


def _mlp_points_kernel(*refs, n_layers, has_transform):
    """Fused [x @ T] -> (matmul+bias+relu)*n, per-point output (bf16)."""
    i = 0
    x_ref = refs[i]; i += 1
    t_ref = None
    if has_transform:
        t_ref = refs[i]; i += 1
    wb = refs[i:i + 2 * n_layers]; i += 2 * n_layers
    o_ref = refs[i]

    h = x_ref[0]
    if has_transform:
        h = jnp.dot(h, t_ref[0], preferred_element_type=jnp.float32)
        h = h.astype(jnp.bfloat16)
    for l in range(n_layers):
        w = wb[2 * l][...]
        b = wb[2 * l + 1][...]
        h = jnp.dot(h, w, preferred_element_type=jnp.float32) + b
        h = jnp.maximum(h, 0.0)
        h = h.astype(jnp.bfloat16)
    o_ref[0] = h.astype(o_ref.dtype)


def _head_kernel(*refs, relu_flags):
    """Fused dense head on the whole (small) batch: chained matmul+bias(+relu)."""
    n = len(relu_flags)
    x_ref = refs[0]
    wb = refs[1:1 + 2 * n]
    o_ref = refs[1 + 2 * n]

    h = x_ref[...].astype(jnp.bfloat16)
    for l, do_relu in enumerate(relu_flags):
        w = wb[2 * l][...]
        b = wb[2 * l + 1][...]
        h = jnp.dot(h, w, preferred_element_type=jnp.float32) + b
        if do_relu:
            h = jnp.maximum(h, 0.0)
        if l < n - 1:
            h = h.astype(jnp.bfloat16)
    o_ref[...] = h


# ----------------------------------------------------------------------------
# pallas_call wrappers
# ----------------------------------------------------------------------------
def _point_specs(x, t, layers, tn):
    _, _, cin = x.shape
    in_specs = [pl.BlockSpec((1, tn, cin), lambda b, n: (b, n, 0))]
    args = [x]
    if t is not None:
        in_specs.append(pl.BlockSpec((1, cin, cin), lambda b, n: (b, 0, 0)))
        args.append(t)
    for w, bias in layers:
        ci, co = w.shape
        in_specs.append(pl.BlockSpec((ci, co), lambda b, n: (0, 0)))
        in_specs.append(pl.BlockSpec((1, co), lambda b, n: (0, 0)))
        args.append(w)
        args.append(bias)
    return in_specs, args


def mlp_max(x, t, layers, tn):
    """x:(B,Npad,Cin) bf16, optional t:(B,Cin,Cin) bf16 -> (B,Cout) f32."""
    B, n_pad, _ = x.shape
    cout = layers[-1][0].shape[1]
    in_specs, args = _point_specs(x, t, layers, tn)
    out = pl.pallas_call(
        functools.partial(_mlp_max_kernel, n_layers=len(layers),
                          has_transform=t is not None),
        out_shape=jax.ShapeDtypeStruct((B, 1, cout), jnp.float32),
        grid=(B, n_pad // tn),
        in_specs=in_specs,
        out_specs=pl.BlockSpec((1, 1, cout), lambda b, n: (b, 0, 0)),
        compiler_params=pltpu.CompilerParams(
            dimension_semantics=("parallel", "arbitrary")),
    )(*args)
    return out.reshape(B, cout)


def mlp_points(x, t, layers, tn):
    """x:(B,Npad,Cin) bf16, optional t:(B,Cin,Cin) bf16 -> (B,Npad,Cout) bf16."""
    B, n_pad, _ = x.shape
    cout = layers[-1][0].shape[1]
    in_specs, args = _point_specs(x, t, layers, tn)
    return pl.pallas_call(
        functools.partial(_mlp_points_kernel, n_layers=len(layers),
                          has_transform=t is not None),
        out_shape=jax.ShapeDtypeStruct((B, n_pad, cout), jnp.bfloat16),
        grid=(B, n_pad // tn),
        in_specs=in_specs,
        out_specs=pl.BlockSpec((1, tn, cout), lambda b, n: (b, n, 0)),
        compiler_params=pltpu.CompilerParams(
            dimension_semantics=("parallel", "parallel")),
    )(*args)


def head_mlp(x, layers, relu_flags):
    """x:(B,Cin) f32, layers of (w_bf16,(1,Cout) f32 bias) -> (B,Cout_last) f32."""
    B, cin = x.shape
    cout = layers[-1][0].shape[1]
    in_specs = [pl.BlockSpec((B, cin), lambda i: (0, 0))]
    args = [x]
    for w, b in layers:
        ci, co = w.shape
        in_specs.append(pl.BlockSpec((ci, co), lambda i: (0, 0)))
        in_specs.append(pl.BlockSpec((1, co), lambda i: (0, 0)))
        args.append(w)
        args.append(b)
    return pl.pallas_call(
        functools.partial(_head_kernel, relu_flags=tuple(relu_flags)),
        out_shape=jax.ShapeDtypeStruct((B, cout), jnp.float32),
        grid=(1,),
        in_specs=in_specs,
        out_specs=pl.BlockSpec((B, cout), lambda i: (0, 0)),
        compiler_params=pltpu.CompilerParams(dimension_semantics=("arbitrary",)),
    )(*args)


# ----------------------------------------------------------------------------
# Deterministic parameter construction (BN folded into weights, bf16 weights)
# ----------------------------------------------------------------------------
def _conv_bn_layer(key, cin, cout):
    # Conv1d/Linear (no bias) + eval-mode BN with default running stats:
    #   scale = 1/sqrt(1+eps) folded into the weight; shift = 0.
    w = 0.05 * jax.random.normal(key, (cin, cout), dtype=jnp.float32)
    w = w / jnp.sqrt(1.0 + EPS)
    b = jnp.zeros((1, cout), jnp.float32)
    return w.astype(jnp.bfloat16), b


def _mlp_params(key, dims):
    layers = []
    for i in range(len(dims) - 1):
        key, sub = jax.random.split(key)
        layers.append(_conv_bn_layer(sub, dims[i], dims[i + 1]))
    return layers, key


def _pad_cout(w, b, cout_pad):
    cout = w.shape[1]
    if cout_pad != cout:
        w = jnp.pad(w, ((0, 0), (0, cout_pad - cout)))
        b = jnp.pad(b, ((0, 0), (0, cout_pad - cout)))
    return w, b


def make_stn_params(key, k):
    mlp1, key = _mlp_params(key, (k, 64, 128, 1024))
    mlp2, key = _mlp_params(key, (1024, 512, 256))
    kk = k * k
    kk_pad = _round_up(kk, LANE)     # lane-pad narrow fc_trans output
    # fc_trans (mode='init_identity'): weight = 0, bias = flattened identity
    w_t = jnp.zeros((256, kk), jnp.float32)
    b_t = jnp.eye(k, dtype=jnp.float32).reshape(1, kk)
    w_t, b_t = _pad_cout(w_t, b_t, kk_pad)
    return {"k": k, "mlp1": mlp1, "mlp2": mlp2,
            "fc_trans": (w_t.astype(jnp.bfloat16), b_t)}, key


def make_pointnet_cls_params(key, k, n_cls):
    input_trans, key = make_stn_params(key, k)
    feat_mlp1, key = _mlp_params(key, (k, 64, 64))
    feat_trans, key = make_stn_params(key, 64)
    feat_mlp2, key = _mlp_params(key, (64, 64, 128, 1024))
    head_layers, key = _mlp_params(key, (1024, 512, 256))
    key, k1, k2 = jax.random.split(key, 3)
    ncls_pad = _round_up(n_cls, LANE)   # lane-pad narrow classifier output
    w_c = 0.05 * jax.random.normal(k1, (256, n_cls), dtype=jnp.float32)
    b_c = 0.05 * jax.random.normal(k2, (1, n_cls), dtype=jnp.float32)
    w_c, b_c = _pad_cout(w_c, b_c, ncls_pad)
    return {
        "k": k, "n_cls": n_cls,
        "feat": {"input_trans": input_trans, "mlp1": feat_mlp1,
                 "feat_trans": feat_trans, "mlp2": feat_mlp2},
        "mlp": head_layers,
        "fc_cls": (w_c.astype(jnp.bfloat16), b_c),
    }


# ----------------------------------------------------------------------------
# Forward pass
# ----------------------------------------------------------------------------
def stn_forward(stn, x_bnc, tn):
    """x_bnc:(B,Npad,Cin) bf16 -> transform matrix (B,k,k) f32."""
    g = mlp_max(x_bnc, None, stn["mlp1"], tn)                  # conv stack + maxpool
    layers = list(stn["mlp2"]) + [stn["fc_trans"]]
    t = head_mlp(g, layers, (True, True, False))               # (B, kk_pad)
    k = stn["k"]
    return t[:, :k * k].reshape(-1, k, k)                      # 'init_identity': no add


def pointnet_cls_forward(params, x_bcn):
    """x_bcn: PyTorch layout (B,k,N).  Returns (cls_pred (B,n_cls), trans_feat (B,64,64))."""
    x = jnp.transpose(x_bcn, (0, 2, 1)).astype(jnp.float32)    # (B, N, k)
    B, N, _ = x.shape
    tn = min(256, _round_up(N, 8))         # point-tile: fits VMEM on v5e/v6e/v7x
    n_pad = _round_up(N, tn)
    if n_pad != N:
        # zero padding is max-safe here: padded points stay 0 through the
        # ReLU stacks (zero BN shift), so they never exceed the true maximum.
        x = jnp.pad(x, ((0, 0), (0, n_pad - N), (0, 0)))
    x = x.astype(jnp.bfloat16)

    feat = params["feat"]
    # input STN: conv(k->64->128->1024)+max fused, then fused dense head
    trans_input = stn_forward(feat["input_trans"], x, tn)               # (B,k,k)
    t_in = jnp.transpose(trans_input, (0, 2, 1)).astype(jnp.bfloat16)   # pre-transpose once

    # fused: (x @ trans_input^T) -> conv(k->64)+BN+ReLU -> conv(64->64)+BN+ReLU
    h1 = mlp_points(x, t_in, feat["mlp1"], tn)                          # (B,Npad,64) bf16

    # feature STN on h1
    trans_feat = stn_forward(feat["feat_trans"], h1, tn)                # (B,64,64)
    t_ft = jnp.transpose(trans_feat, (0, 2, 1)).astype(jnp.bfloat16)

    # fused: (h1 @ trans_feat^T) -> conv(64->64->128->1024) -> max over points;
    # the (B,N,1024) point features never hit HBM.
    g = mlp_max(h1, t_ft, feat["mlp2"], tn)                             # (B,1024) f32

    # TODO(synk): Dropout(p=0.3) applied as inference-mode identity (no stochastic mask).
    layers = list(params["mlp"]) + [params["fc_cls"]]
    logits = head_mlp(g, layers, (True, True, False))                   # (B, ncls_pad)
    cls_pred = logits[:, :params["n_cls"]]
    return cls_pred, trans_feat


# ----------------------------------------------------------------------------
if __name__ == "__main__":
    B, K, N_PTS, N_CLS = 2, 14, 64, 10

    key = jax.random.PRNGKey(0)
    key, pkey, xkey = jax.random.split(key, 3)
    params = make_pointnet_cls_params(pkey, K, N_CLS)
    x = jax.random.normal(xkey, (B, K, N_PTS), dtype=jnp.float32)  # PyTorch NCW layout

    cls_pred, trans_feat = pointnet_cls_forward(params, x)
    jax.block_until_ready((cls_pred, trans_feat))

    assert cls_pred.shape == (B, N_CLS), cls_pred.shape
    assert trans_feat.shape == (B, 64, 64), trans_feat.shape
    assert bool(jnp.all(jnp.isfinite(cls_pred)))
    assert bool(jnp.all(jnp.isfinite(trans_feat)))
    print("KERNEL_OK")
</pallas_src>

<mosaic_0001>
module attributes {stable_mosaic.version = 11 : i64} {
  func.func @_mlp_max_kernel(%arg0: i32, %arg1: i32, %arg2: memref<1x64x14xbf16, #tpu.memory_space<vmem>>, %arg3: memref<14x64xbf16, #tpu.memory_space<vmem>>, %arg4: memref<1x64xf32, #tpu.memory_space<vmem>>, %arg5: memref<64x128xbf16, #tpu.memory_space<vmem>>, %arg6: memref<1x128xf32, #tpu.memory_space<vmem>>, %arg7: memref<128x1024xbf16, #tpu.memory_space<vmem>>, %arg8: memref<1x1024xf32, #tpu.memory_space<vmem>>, %arg9: memref<1x1x1024xf32, #tpu.memory_space<vmem>>) attributes {dimension_semantics = [#tpu.dimension_semantics<parallel>, #tpu.dimension_semantics<arbitrary>], iteration_bounds = array<i64: 2, 1>, scalar_prefetch = 0 : i64, scratch_operands = 0 : i64, tpu.core_type = #tpu.core_type<tc>, window_params = [{transform_indices = @transform_0, window_bounds = array<i64: 1, 64, 14>}, {pipeline_mode = #tpu.pipeline_mode<synchronous>, transform_indices = @transform_1, window_bounds = array<i64: 14, 64>}, {pipeline_mode = #tpu.pipeline_mode<synchronous>, transform_indices = @transform_2, window_bounds = array<i64: 1, 64>}, {pipeline_mode = #tpu.pipeline_mode<synchronous>, transform_indices = @transform_3, window_bounds = array<i64: 64, 128>}, {pipeline_mode = #tpu.pipeline_mode<synchronous>, transform_indices = @transform_4, window_bounds = array<i64: 1, 128>}, {pipeline_mode = #tpu.pipeline_mode<synchronous>, transform_indices = @transform_5, window_bounds = array<i64: 128, 1024>}, {pipeline_mode = #tpu.pipeline_mode<synchronous>, transform_indices = @transform_6, window_bounds = array<i64: 1, 1024>}, {transform_indices = @transform_7, window_bounds = array<i64: 1, 1, 1024>}]} {
    %c0 = arith.constant 0 : index
    %c0_0 = arith.constant 0 : index
    %c0_1 = arith.constant 0 : index
    %0 = vector.load %arg2[%c0, %c0_0, %c0_1] : memref<1x64x14xbf16, #tpu.memory_space<vmem>>, vector<1x64x14xbf16>
    %1 = vector.shape_cast %0 : vector<1x64x14xbf16> to vector<64x14xbf16>
    %c0_2 = arith.constant 0 : index
    %c0_3 = arith.constant 0 : index
    %2 = vector.load %arg3[%c0_2, %c0_3] : memref<14x64xbf16, #tpu.memory_space<vmem>>, vector<14x64xbf16>
    %c0_4 = arith.constant 0 : index
    %c0_5 = arith.constant 0 : index
    %3 = vector.load %arg4[%c0_4, %c0_5] : memref<1x64xf32, #tpu.memory_space<vmem>>, vector<1x64xf32>
    %cst = arith.constant dense<0.000000e+00> : vector<64x64xf32>
    %4 = tpu.matmul %1, %2, %cst {dimension_numbers = #tpu.dot_dimension_numbers<[1], [0], [0], [1], [0, 0, 1, 1], [], []>} : vector<64x14xbf16>, vector<14x64xbf16>, vector<64x64xf32> -> vector<64x64xf32>
    %5 = vector.broadcast %3 : vector<1x64xf32> to vector<64x64xf32>
    %6 = arith.addf %4, %5 : vector<64x64xf32>
    %cst_6 = arith.constant 0.000000e+00 : f32
    %7 = vector.broadcast %cst_6 : f32 to vector<64x64xf32>
    %8 = arith.maximumf %6, %7 : vector<64x64xf32>
    %9 = arith.truncf %8 : vector<64x64xf32> to vector<64x64xbf16>
    %c0_7 = arith.constant 0 : index
    %c0_8 = arith.constant 0 : index
    %10 = vector.load %arg5[%c0_7, %c0_8] : memref<64x128xbf16, #tpu.memory_space<vmem>>, vector<64x128xbf16>
    %c0_9 = arith.constant 0 : index
    %c0_10 = arith.constant 0 : index
    %11 = vector.load %arg6[%c0_9, %c0_10] : memref<1x128xf32, #tpu.memory_space<vmem>>, vector<1x128xf32>
    %cst_11 = arith.constant dense<0.000000e+00> : vector<64x128xf32>
    %12 = tpu.matmul %9, %10, %cst_11 {dimension_numbers = #tpu.dot_dimension_numbers<[1], [0], [0], [1], [0, 0, 1, 1], [], []>} : vector<64x64xbf16>, vector<64x128xbf16>, vector<64x128xf32> -> vector<64x128xf32>
    %13 = vector.broadcast %11 : vector<1x128xf32> to vector<64x128xf32>
    %14 = arith.addf %12, %13 : vector<64x128xf32>
    %cst_12 = arith.constant 0.000000e+00 : f32
    %15 = vector.broadcast %cst_12 : f32 to vector<64x128xf32>
    %16 = arith.maximumf %14, %15 : vector<64x128xf32>
    %17 = arith.truncf %16 : vector<64x128xf32> to vector<64x128xbf16>
    %c0_13 = arith.constant 0 : index
    %c0_14 = arith.constant 0 : index
    %18 = vector.load %arg7[%c0_13, %c0_14] : memref<128x1024xbf16, #tpu.memory_space<vmem>>, vector<128x1024xbf16>
    %c0_15 = arith.constant 0 : index
    %c0_16 = arith.constant 0 : index
    %19 = vector.load %arg8[%c0_15, %c0_16] : memref<1x1024xf32, #tpu.memory_space<vmem>>, vector<1x1024xf32>
    %cst_17 = arith.constant dense<0.000000e+00> : vector<64x1024xf32>
    %20 = tpu.matmul %17, %18, %cst_17 {dimension_numbers = #tpu.dot_dimension_numbers<[1], [0], [0], [1], [0, 0, 1, 1], [], []>} : vector<64x128xbf16>, vector<128x1024xbf16>, vector<64x1024xf32> -> vector<64x1024xf32>
    %21 = vector.broadcast %19 : vector<1x1024xf32> to vector<64x1024xf32>
    %22 = arith.addf %20, %21 : vector<64x1024xf32>
    %cst_18 = arith.constant 0.000000e+00 : f32
    %23 = vector.broadcast %cst_18 : f32 to vector<64x1024xf32>
    %24 = arith.maximumf %22, %23 : vector<64x1024xf32>
    %cst_19 = arith.constant dense<0xFF800000> : vector<1024xf32>
    %25 = vector.multi_reduction <maximumf>, %24, %cst_19 [0] : vector<64x1024xf32> to vector<1024xf32>
    %26 = vector.shape_cast %25 : vector<1024xf32> to vector<1x1024xf32>
    %c0_i32 = arith.constant 0 : i32
    %27 = arith.cmpi eq, %arg1, %c0_i32 : i32
    %28 = arith.extui %27 : i1 to i32
    %c0_i32_20 = arith.constant 0 : i32
    %29 = arith.cmpi ne, %28, %c0_i32_20 : i32
    scf.if %29 {
      %c0_23 = arith.constant 0 : index
      %c0_24 = arith.constant 0 : index
      %c0_25 = arith.constant 0 : index
      %33 = vector.load %arg9[%c0_23, %c0_24, %c0_25] : memref<1x1x1024xf32, #tpu.memory_space<vmem>>, vector<1x1x1024xf32>
      %34 = vector.shape_cast %33 : vector<1x1x1024xf32> to vector<1x1024xf32>
      %35 = vector.shape_cast %26 : vector<1x1024xf32> to vector<1x1x1024xf32>
      tpu.vector_store %arg9[%c0_23, %c0_24, %c0_25], %35 {strides = array<i32>} : memref<1x1x1024xf32, #tpu.memory_space<vmem>>, vector<1x1x1024xf32>,
    } else {
    }
    %c0_i32_21 = arith.constant 0 : i32
    %30 = arith.cmpi sgt, %arg1, %c0_i32_21 : i32
    %31 = arith.extui %30 : i1 to i32
    %c0_i32_22 = arith.constant 0 : i32
    %32 = arith.cmpi ne, %31, %c0_i32_22 : i32
    scf.if %32 {
      %c0_23 = arith.constant 0 : index
      %c0_24 = arith.constant 0 : index
      %c0_25 = arith.constant 0 : index
      %33 = vector.load %arg9[%c0_23, %c0_24, %c0_25] : memref<1x1x1024xf32, #tpu.memory_space<vmem>>, vector<1x1x1024xf32>
      %34 = vector.shape_cast %33 : vector<1x1x1024xf32> to vector<1x1024xf32>
      %35 = arith.maximumf %34, %26 : vector<1x1024xf32>
      %c0_26 = arith.constant 0 : index
      %c0_27 = arith.constant 0 : index
      %c0_28 = arith.constant 0 : index
      %36 = vector.load %arg9[%c0_26, %c0_27, %c0_28] : memref<1x1x1024xf32, #tpu.memory_space<vmem>>, vector<1x1x1024xf32>
      %37 = vector.shape_cast %36 : vector<1x1x1024xf32> to vector<1x1024xf32>
      %38 = vector.shape_cast %35 : vector<1x1024xf32> to vector<1x1x1024xf32>
      tpu.vector_store %arg9[%c0_26, %c0_27, %c0_28], %38 {strides = array<i32>} : memref<1x1x1024xf32, #tpu.memory_space<vmem>>, vector<1x1x1024xf32>,
    } else {
    }
    return
  }
  func.func @transform_0(%arg0: i32, %arg1: i32) -> (i32, i32, i32) {
    %c0_i32 = arith.constant 0 : i32
    %c0_i32_0 = arith.constant 0 : i32
    return %arg0, %arg1, %c0_i32 : i32, i32, i32
  }
  func.func @transform_1(%arg0: i32, %arg1: i32) -> (i32, i32) {
    %c0_i32 = arith.constant 0 : i32
    %c0_i32_0 = arith.constant 0 : i32
    %c0_i32_1 = arith.constant 0 : i32
    return %c0_i32, %c0_i32_0 : i32, i32
  }
  func.func @transform_2(%arg0: i32, %arg1: i32) -> (i32, i32) {
    %c0_i32 = arith.constant 0 : i32
    %c0_i32_0 = arith.constant 0 : i32
    %c0_i32_1 = arith.constant 0 : i32
    return %c0_i32, %c0_i32_0 : i32, i32
  }
  func.func @transform_3(%arg0: i32, %arg1: i32) -> (i32, i32) {
    %c0_i32 = arith.constant 0 : i32
    %c0_i32_0 = arith.constant 0 : i32
    %c0_i32_1 = arith.constant 0 : i32
    return %c0_i32, %c0_i32_0 : i32, i32
  }
  func.func @transform_4(%arg0: i32, %arg1: i32) -> (i32, i32) {
    %c0_i32 = arith.constant 0 : i32
    %c0_i32_0 = arith.constant 0 : i32
    %c0_i32_1 = arith.constant 0 : i32
    return %c0_i32, %c0_i32_0 : i32, i32
  }
  func.func @transform_5(%arg0: i32, %arg1: i32) -> (i32, i32) {
    %c0_i32 = arith.constant 0 : i32
    %c0_i32_0 = arith.constant 0 : i32
    %c0_i32_1 = arith.constant 0 : i32
    return %c0_i32, %c0_i32_0 : i32, i32
  }
  func.func @transform_6(%arg0: i32, %arg1: i32) -> (i32, i32) {
    %c0_i32 = arith.constant 0 : i32
    %c0_i32_0 = arith.constant 0 : i32
    %c0_i32_1 = arith.constant 0 : i32
    return %c0_i32, %c0_i32_0 : i32, i32
  }
  func.func @transform_7(%arg0: i32, %arg1: i32) -> (i32, i32, i32) {
    %c0_i32 = arith.constant 0 : i32
    %c0_i32_0 = arith.constant 0 : i32
    %c0_i32_1 = arith.constant 0 : i32
    return %arg0, %c0_i32, %c0_i32_0 : i32, i32, i32
  }
}

</mosaic_0001>

<bundles_post_ra>
// kernel: tpu_custom_call.1
= control target key start
LH: loop header
LB: loop body
LE: loop exit
PB: predicated region body
PF: predicated region fallthrough
CT: control target
= control target key end

     0   :  { %12 = vsyncpa [#allocation3], 0  ;;  %s2428_s0 = inlined_call_operand.vmem [shape: bf16[2,64,14], index: 0, kind: input, shape index: {}]   ;;  %s2429_s1 = inlined_call_operand.vmem [shape: bf16[14,64], index: 1, kind: input, shape index: {}]   ;;  %s2430_s2 = inlined_call_operand.vmem [shape: f32[1,64], index: 2, kind: input, shape index: {}]   ;;  %s2431_s3 = inlined_call_operand.vmem [shape: bf16[64,128], index: 3, kind: input, shape index: {}]   ;;  %s2432_s4 = inlined_call_operand.vmem [shape: f32[1,128], index: 4, kind: input, shape index: {}]   ;;  %s2433_s5 = inlined_call_operand.hbm [shape: bf16[128,1024], index: 5, kind: input, shape index: {}]   ;;  %s2434_s6 = inlined_call_operand.vmem [shape: f32[1,1024], index: 6, kind: input, shape index: {}]   ;;  %s2435_s7 = inlined_call_operand.hbm [shape: f32[2,1,1024], index: 7, kind: output, shape index: {}]  }
   0x1   :  { %13 = vsyncpa [#allocation4], 0 }
   0x2   :  { %15 = vsyncpa [#allocation4 + $0x1], 0  ;;  %s2077_s24 = smov 0   ;;  %s2079_s25 = smov 0  }
   0x3   :  { %s2081_s26 = smov 0   ;;  %s2083_s27 = smov 0  }
   0x4   :  { %s2085_s28 = smov 0   ;;  %s2087_s29 = smov 0  }
   0x5 LB: > { %s1700_s30 = sadd.s32 4294967295, %s2029_s29   ;;  %s1701_s8 = sadd.s32 4294967294, %s2029_s29   ;;  %s2029_s29 = sphi %s2087_s29, %s21_s29   ;;  %s2025_s28 = sphi %s2085_s28, %s2453_s28   ;;  %s2021_s27 = sphi %s2083_s27, %s2452_s27   ;;  %s2017_s26 = sphi %s2081_s26, %s2451_s26   ;;  %s2013_s25 = sphi %s2079_s25, %s2450_s25   ;;  %s2009_s24 = sphi %s2077_s24, %s2449_s24  }
   0x6   : > { %s33_s9 = sadd.s32 1, %s2025_s28  ;;  %s194_s10 = sadd.s32 1, %s2017_s26 }
   0x7   : > { %p35_p0 = scmp.ge.s32.totalorder %s33_s9, 2  ;;  %p204_p1 = scmp.ne.s32.totalorder %s2017_s26, %s2013_s25 }
   0x8   : > { %p205_p2 = scmp.eq.s32.totalorder %s1700_s30, 1  ;;  %p210_p3 = scmp.ne.s32.totalorder %s2013_s25, %s2009_s24 }
   0x9   : > { %s2455_s9 = smov (%p35_p0, %s33_s9), 0  ;;  %p211_p5 = scmp.eq.s32.totalorder %s1701_s8, 1 }
   0xa   : > { %p2117_p4 = por %p205_p2, %p204_p1  ;;  %s191_s12 = ssub.s32 %s2025_s28, %s2455_s9 }
   0xb   : > { %p1702_p6 = scmp.ge.s32.totalorder %s2029_s29, 1  ;;  %p192_p7 = scmp.eq.s32.totalorder %s191_s12, 0 }
   0xc   : > { %s2440_s11 = scalar_select %p2117_p4, 1, 0 }
   0xd   : > { %p2124_p8 = por %p211_p5, %p210_p3  ;;  %p218_p9 = scmp.lt.s32.totalorder %s2029_s29, 3 }
   0xe   : > { %s2130_s14 = scalar_select %p192_p7, %s2017_s26, %s194_s10  }
   0xf   : > { %s2441_s13 = scalar_select %p2124_p8, 1, 0 }
  0x10   : > { %p2132_p10 = pnand %p1702_p6, %p218_p9  ;;  %p2136_p11 = scmp.eq.s32.totalorder %s1700_s30, 0 }
  0x11   : > { %s2031_s17 = smov [#allocation2]   ;;  %s1919_s22 = scalar_lea.hbm %s2433_s5, 8192 }
  0x12   : > { %s2442_s15 = scalar_select %p2132_p10, 1, 0 }
  0x13   : > { %s2443_s16 = scalar_select %p2136_p11, 1, 0 }
  0x14   : > { %p1846_p12 = pneg %p2132_p10  ;;  %s242_s18 = sshll.u32 %s2031_s17, 4  ;;  %s243_s18 = int_to_ptr.vmem [resolvable:$true] %s242_s18 }
  0x15   : > { %p1920_p0 = scmp.ne.s32.totalorder %s2433_s5, %s1919_s22  ;;  %p1926_p5 = scmp.lt.u32.totalorder %s1919_s22, %s2433_s5 }
  0x16   : > { %p2144_p13 = pnand %p2136_p11, %p1846_p12 }
  0x18   : > { %p1921_p1 = pneg %p2144_p13 }
  0x1a   : > { %p1922_p2 = pnand %p1921_p1, %p1920_p0 }
  0x1c   : > { %p1923_p3 = pneg %p1922_p2 }
  0x1e   : > { %p1928_p6 = pnand %p1926_p5, %p1923_p3 }
  0x20   : > { %1931 = shalt.err (!%p1928_p6)
}
  0x21   : > { %s1932_s12 = scalar_lea.vmem %s243_s18, 8192  ;;  %p1940_p8 = scmp.lt.s32.totalorder %s243_s18, %s243_s18 }
  0x22   : > { %p1933_p7 = scmp.ne.s32.totalorder %s243_s18, %s1932_s12  ;;  %p1941_p4 = scmp.lt.s32.totalorder %s1932_s12, %s1932_s12 }
  0x24   : > { %p1935_p9 = pnand %p1933_p7, %p1921_p1  ;;  %p1942_p11 = por %p1941_p4, %p1940_p8 }
  0x26   : > { %p1936_p12 = pneg %p1935_p9 }
  0x28   : > { %p1943_p10 = pnand %p1942_p11, %p1936_p12 }
  0x2a   : > { %1946 = shalt.err (!%p1943_p10)
}
  0x2b   : > { %s2032_s17 = smov 512   ;;  %s2033_s20 = smov 32  }
  0x2c   : > { %1849 = dma.hbm_to_vmem [thread:$0]  (!%p2144_p13), %s2433_s5, 8192, %s243_s18, [#allocation3], %s2032_s17, %s2032_s17, %s2033_s20  }
  0x2d   : > { %p2445_p0 = scmp.ne.s32.totalorder %s2442_s15, 0 }
  0x2e   : > { %p2446_p2 = scmp.ne.s32.totalorder (!%p2445_p0), %s2443_s16, 0 }
  0x2f   : > { %274 = sbr.rel (%p2445_p0) target bundleno = 819 (0x333), region = 48 }
  0x36   : > { %2000 = dma.done.wait (%p2446_p2), [#allocation3], 8192  }
  0x37   : > { %2002 = vsyncadd (%p2446_p2), [#allocation3], 4294959104  ;;  %p311_p4 = scmp.lt.s32.totalorder %s2021_s27, 1  ;;  %vm376_vm0 = vcmask 1046528   ;;  %vm363_vm1 = vcmask 113664   ;;  %v1915_v5 = vld [vmem:[%s2431_s3] sm:$0xff]  }
  0x38   : > { %v1910_v0 = vld [vmem:[%s2429_s1] sm:$0x7f]   ;;  %v1916_v6 = vld [vmem:[%s2431_s3 + $0x8] sm:$0xff]   ;;  %1823 = vmatprep.subr.bf16.mxu1 %v1915_v5  ;;  %v1917_v8 = vld [vmem:[%s2431_s3 + $0x10] sm:$0xff]   ;;  %vm496_vm2 = vcmask 523264   ;;  %s307_s12 = sand.u32 1, %s2013_s25  }
  0x39   : > { %s312_s22 = scalar_select %p311_p4, %s2021_s27, 1  ;;  %1839 = vmatprep.subr.msk.bf16.mxu0 %vm376_vm0, %v1910_v0  ;;  %v378_v2 = vsel %vm376_vm0, %v1910_v0, 0  ;;  %1824 = vmatpush3.bf16.msra.mxu1 %v1915_v5  ;;  %v1918_v9 = vld [vmem:[%s2431_s3 + $0x18] sm:$0xff]   ;;  %v586_v10 = vld [vmem:[#allocation2] sm:$0xff]  ;;  %v2194_v12 = vld [vmem:[#allocation2 + $0x8] sm:$0xff] }
  0x3a   : > { %1814 = vmatpush3.bf16.msra.mxu0 %v378_v2  ;;  %1825 = vmatprep.subr.bf16.mxu1 %v1916_v6  ;;  %v590_v11 = vld [vmem:[#allocation2 + $0x20] sm:$0xff]  ;;  %v2196_v15 = vld [vmem:[#allocation2 + $0x28] sm:$0xff]  ;;  %s1707_s17 = sshll.u32 %s307_s12, 3  ;;  %s1799_s20 = sshll.u32 %s2021_s27, 7 }
  0x3b   : > { %s1798_s30 = sshll.u32 %s312_s22, 5  ;;  %v1729_v13 = vcombine.low %v586_v10, %v590_v11  ;;  %v1730_v14 = vcombine.high %v586_v10, %v590_v11  ;;  %v594_v16 = vld [vmem:[#allocation2 + $0x40] sm:$0xff]  ;;  %v1731_v18 = vcombine.low %v2194_v12, %v2196_v15  ;;  %v1732_v19 = vcombine.high %v2194_v12, %v2196_v15  ;;  %v595_v51 = vld [vmem:[#allocation2 + $0x48] sm:$0xff]  ;;  %s309_s21 = scalar_lea.vmem [#allocation5], %s1707_s17 }
  0x3c   : > { %s318_s10 = scalar_lea.vmem %s2428_s0, %s1798_s30  ;;  %v598_v17 = vld [vmem:[#allocation2 + $0x60] sm:$0xff]  ;;  %v599_v52 = vld [vmem:[#allocation2 + $0x68] sm:$0xff]  ;;  %s1615_s23 = sshll.u32 %s309_s21, 4  ;;  %s2383_s23 = int_to_ptr.vmem [resolvable:$true] %s1615_s23 }
  0x3d   : > { %v1911_v1 = vld [vmem:[%s318_s10] sm:$0xff]   ;;  %v1912_v3 = vld [vmem:[%s318_s10 + $0x8] sm:$0xff]   ;;  %v1913_v4 = vld [vmem:[%s318_s10 + $0x10] sm:$0xff]   ;;  %1826 = vmatpush3.bf16.msra.mxu1 %v1916_v6  ;;  %v1738_v20 = vcombine.high %v594_v16, %v598_v17  ;;  %1012 = vmatprep.subr.bf16.mxu0 %v1730_v14  ;;  %v1737_v23 = vcombine.low %v594_v16, %v598_v17  ;;  %v1740_v58 = vcombine.high %v595_v51, %v599_v52  ;;  %s2381_s8 = scalar_lea.hbm %s2435_s7, %s1799_s20  ;;  %s1601_s27 = scalar_lea.sflag [#allocation4], %s307_s12 }
  0x3e   : > { %1815 = vmatprep.mubr.msk.bf16.mxu0 %vm363_vm1, %v1911_v1  ;;  %v1914_v7 = vld [vmem:[%s318_s10 + $0x18] sm:$0xff]   ;;  %1827 = vmatprep.subr.bf16.mxu1 %v1917_v8  ;;  %v602_v21 = vld [vmem:[#allocation2 + $0x80] sm:$0xff]  ;;  %v603_v61 = vld [vmem:[#allocation2 + $0x88] sm:$0xff]  ;;  %s1947_s19 = scalar_lea.vmem %s2383_s23, 128  ;;  %p2447_p10 = scmp.ne.s32.totalorder %s2440_s11, 0 }
  0x3f   : > { %1816 = vmatmul.mubr.msk.bf16.vlgmr.msra.gmra.mrb[0].mxu0 %vm363_vm1, %v1912_v3  ;;  %v606_v22 = vld [vmem:[#allocation2 + $0xa0] sm:$0xff]  ;;  %v607_v62 = vld [vmem:[#allocation2 + $0xa8] sm:$0xff]  ;;  %p1948_p8 = scmp.ne.s32.totalorder %s2383_s23, %s1947_s19  ;;  %s2036_s10 = smov [#allocation5]  }
  0x40   : > { %1819 = vmatprep.mubr.msk.bf16.mxu0 %vm363_vm1, %v1913_v4  ;;  %1013 = vmatpush1.bf16.msra.mxu0 %v1729_v13  ;;  %v1746_v24 = vcombine.high %v602_v21, %v606_v22  ;;  %v610_v25 = vld [vmem:[#allocation2 + $0xc0] sm:$0xff]  ;;  %v1745_v27 = vcombine.low %v602_v21, %v606_v22  ;;  %v1739_v4 = vcombine.low %v595_v51, %v599_v52  ;;  %v619_v16 = vld [vmem:[#allocation2 + $0x108] sm:$0xff]  ;;  %s1951_s18 = sshll.u32 %s2036_s10, 4  ;;  %s1952_s18 = int_to_ptr.vmem [resolvable:$false] %s1951_s18 }
  0x41   : > { %1828 = vmatpush3.bf16.msra.mxu1 %v1917_v8  ;;  %1014 = vmatprep.subr.bf16.mxu0 %v1738_v20  ;;  %v614_v26 = vld [vmem:[#allocation2 + $0xe0] sm:$0xff]  ;;  %v1748_v6 = vcombine.high %v603_v61, %v607_v62  ;;  %v611_v8 = vld [vmem:[#allocation2 + $0xc8] sm:$0xff]  ;;  %v1747_v13 = vcombine.low %v603_v61, %v607_v62  ;;  %v597_v61 = vld [vmem:[#allocation2 + $0x58] sm:$0xff]  ;;  %p1949_p11 = pnand %p1948_p8, %p2447_p10  ;;  %s1953_s15 = scalar_lea.vmem %s1952_s18, 256 }
  0x42   : > { %1829 = vmatprep.subr.bf16.mxu1 %v1918_v9  ;;  %v1754_v28 = vcombine.high %v610_v25, %v614_v26  ;;  %v618_v29 = vld [vmem:[#allocation2 + $0x100] sm:$0xff]  ;;  %v1753_v31 = vcombine.low %v610_v25, %v614_v26  ;;  %v623_v17 = vld [vmem:[#allocation2 + $0x128] sm:$0xff]  ;;  %v601_v62 = vld [vmem:[#allocation2 + $0x78] sm:$0xff]  ;;  %p1954_p1 = scmp.lt.s32.totalorder %s2383_s23, %s1952_s18  ;;  %p1955_p3 = scmp.lt.s32.totalorder %s1953_s15, %s1947_s19 }
  0x43   : > { %v622_v30 = vld [vmem:[#allocation2 + $0x120] sm:$0xff]  ;;  %v1764_v15 = vcombine.high %v619_v16, %v623_v17  ;;  %v1763_v20 = vcombine.low %v619_v16, %v623_v17  ;;  %v635_v25 = vld [vmem:[#allocation2 + $0x188] sm:$0xff]  ;;  %p1950_p13 = pneg %p1949_p11 }
  0x44   : > { %1015 = vmatpush1.bf16.msra.mxu0 %v1737_v23  ;;  %v1762_v32 = vcombine.high %v618_v29, %v622_v30  ;;  %v626_v33 = vld [vmem:[#allocation2 + $0x140] sm:$0xff]  ;;  %v1761_v35 = vcombine.low %v618_v29, %v622_v30  ;;  %p1956_p5 = por %p1955_p3, %p1954_p1 }
  0x45   : > { %1830 = vmatpush3.bf16.msra.mxu1 %v1918_v9  ;;  %1016 = vmatprep.subr.bf16.mxu0 %v1746_v24  ;;  %v630_v34 = vld [vmem:[#allocation2 + $0x160] sm:$0xff]  ;;  %v615_v9 = vld [vmem:[#allocation2 + $0xe8] sm:$0xff] }
  0x46   : > { %1085 = vmatprep.subr.bf16.mxu1 %v1732_v19  ;;  %v1770_v36 = vcombine.high %v626_v33, %v630_v34  ;;  %v1769_v37 = vcombine.low %v626_v33, %v630_v34  ;;  %v1710_v38 = vld [vmem:[%s2430_s2] ss:$0 sm:$0xff]  ;;  %v1756_v14 = vcombine.high %v611_v8, %v615_v9  ;;  %v1755_v12 = vcombine.low %v611_v8, %v615_v9  ;;  %v631_v19 = vld [vmem:[#allocation2 + $0x168] sm:$0xff]  ;;  %v608_v9 = vld [vmem:[#allocation2 + $0xb0] sm:$0xff]  ;;  %p1957_p6 = pnand %p1956_p5, %p1950_p13 }
  0x47   : > { %1820 = vmatmul.mubr.msk.bf16.gmra.mrb[4].mxu0 %vm363_vm1, %v1914_v7  ;;  %v634_v23 = vld [vmem:[#allocation2 + $0x180] sm:$0xff]  ;;  %v643_v33 = vld [vmem:[#allocation2 + $0x1c8] sm:$0xff] }
  0x48   : > { %1017 = vmatpush1.bf16.msra.mxu0 %v1745_v27  ;;  %v638_v24 = vld [vmem:[#allocation2 + $0x1a0] sm:$0xff]  ;;  %v639_v27 = vld [vmem:[#allocation2 + $0x1a8] sm:$0xff] }
  0x49   : > { %1018 = vmatprep.subr.bf16.mxu0 %v1754_v28  ;;  %v1778_v26 = vcombine.high %v634_v23, %v638_v24  ;;  %v1777_v28 = vcombine.low %v634_v23, %v638_v24  ;;  %v1779_v29 = vcombine.low %v635_v25, %v639_v27  ;;  %v1780_v30 = vcombine.high %v635_v25, %v639_v27  ;;  %v612_v23 = vld [vmem:[#allocation2 + $0xd0] sm:$0xff]  ;;  %v617_v27 = vld [vmem:[#allocation2 + $0xf8] sm:$0xff] }
  0x4a   : > { %v616_v25 = vld [vmem:[#allocation2 + $0xf0] sm:$0xff] }
  0x4c   : > { %1019 = vmatpush1.bf16.msra.mxu0 %v1753_v31  ;;  %v642_v31 = vld [vmem:[#allocation2 + $0x1c0] sm:$0xff] }
  0x4d   : > { %1020 = vmatprep.subr.bf16.mxu0 %v1762_v32  ;;  %v646_v32 = vld [vmem:[#allocation2 + $0x1e0] sm:$0xff] }
  0x4e   : > { %v1786_v34 = vcombine.high %v642_v31, %v646_v32 }
  0x50   : > { %1021 = vmatpush1.bf16.msra.mxu0 %v1761_v35  ;;  %v647_v35 = vld [vmem:[#allocation2 + $0x1e8] sm:$0xff] }
  0x51   : > { %1022 = vmatprep.subr.bf16.mxu0 %v1770_v36  ;;  %v1785_v36 = vcombine.low %v642_v31, %v646_v32 }
  0x54   : > { %1023 = vmatpush1.bf16.msra.mxu0 %v1769_v37  ;;  %v1787_v37 = vcombine.low %v643_v33, %v647_v35 }
  0x55   : > { %1024 = vmatprep.subr.bf16.mxu0 %v1778_v26  ;;  %v613_v26 = vld [vmem:[#allocation2 + $0xd8] sm:$0xff] }
  0x58   : > { %1025 = vmatpush1.bf16.msra.mxu0 %v1777_v28 }
  0x59   : > { %1026 = vmatprep.subr.bf16.mxu0 %v1786_v34  ;;  %v1760_v34 = vcombine.high %v613_v26, %v617_v27 }
  0x5c   : > { %1027 = vmatpush1.bf16.msra.mxu0 %v1785_v36  ;;  %v624_v36 = vld [vmem:[#allocation2 + $0x130] sm:$0xff] }
 0x112   : > { %v1817_v39 = vpop.f32.mrb[0].mxu0 }
 0x113   : > { %v423_v40 = vadd.f32 %v1817_v39, %v1710_v38  ;;  %v414_v41 = vpop.f32.mrb[1].mxu0  ;;  %v588_v39 = vld [vmem:[#allocation2 + $0x10] sm:$0xff] }
 0x114   : > { %v415_v42 = vadd.f32 %v1710_v38, %v414_v41  ;;  %v1818_v43 = vpop.f32.mrb[2].mxu0  ;;  %v589_v41 = vld [vmem:[#allocation2 + $0x18] sm:$0xff] }
 0x115   : > { %v426_v44 = vadd.f32 %v1818_v43, %v1710_v38  ;;  %v417_v45 = vpop.f32.mrb[3].mxu0  ;;  %v447_v47 = vmax.f32 %v423_v40, 0.0  ;;  %v592_v40 = vld [vmem:[#allocation2 + $0x30] sm:$0xff]  ;;  %v593_v43 = vld [vmem:[#allocation2 + $0x38] sm:$0xff] }
 0x116   : > { %v418_v46 = vadd.f32 %v1710_v38, %v417_v45  ;;  %v445_v49 = vmax.f32 %v415_v42, 0.0  ;;  %v1734_v42 = vcombine.high %v588_v39, %v592_v40  ;;  %v1733_v45 = vcombine.low %v588_v39, %v592_v40 }
 0x117   : > { %v448_v48 = vmax.f32 %v426_v44, 0.0  ;;  %v2034_v44 = vmov 0   ;;  %v1757_v39 = vcombine.low %v612_v23, %v616_v25  ;;  %v1759_v40 = vcombine.low %v613_v26, %v617_v27 }
 0x118   : > { %v446_v50 = vmax.f32 %v418_v46, 0.0  ;;  %1044 = vmatprep.mubr.bf16.mxu0 %v2034_v44  ;;  %v1735_v46 = vcombine.low %v589_v41, %v593_v43  ;;  %1158 = vmatprep.subr.bf16.mxu0 %v1734_v42 }
 0x119   : > { %v454_v53 = vpack.c.bf16 %v448_v48, %v447_v47  ;;  %v1736_v47 = vcombine.high %v589_v41, %v593_v43  ;;  %v1720_v48 = vld [vmem:[%s2432_s4] ss:$0 sm:$0xff]  ;;  %v628_v43 = vld [vmem:[#allocation2 + $0x150] sm:$0xff] }
 0x11a   : > { %v1821_v54 = vpop.f32.mrb[4].mxu0  ;;  %v453_v55 = vpack.c.bf16 %v446_v50, %v445_v49 }
 0x11b   : > { %v439_v56 = vadd.f32 %v1821_v54, %v1710_v38  ;;  %v430_v57 = vpop.f32.mrb[5].mxu0 }
 0x11c   : > { %v431_v59 = vadd.f32 %v1710_v38, %v430_v57  ;;  %1831 = vmatprep.mubr.msk.bf16.mxu1 %vm496_vm2, %v453_v55  ;;  %v1822_v60 = vpop.f32.mrb[6].mxu0  ;;  %v596_v57 = vld [vmem:[#allocation2 + $0x50] sm:$0xff] }
 0x11d   : > { %v451_v63 = vmax.f32 %v439_v56, 0.0  ;;  %v442_v0 = vadd.f32 %v1822_v60, %v1710_v38  ;;  %1832 = vmatmul.mubr.msk.bf16.vlgmr.msra.gmra.mrb[0].mxu1 %vm496_vm2, %v454_v53  ;;  %v433_v1 = vpop.f32.mrb[7].mxu0  ;;  %v600_v60 = vld [vmem:[#allocation2 + $0x70] sm:$0xff] }
 0x11e   : > { %v449_v2 = vmax.f32 %v431_v59, 0.0  ;;  %v434_v3 = vadd.f32 %v1710_v38, %v433_v1  ;;  %1086 = vmatpush1.bf16.msra.mxu1 %v1731_v18  ;;  %v627_v18 = vld [vmem:[#allocation2 + $0x148] sm:$0xff]  ;;  %v1788_v38 = vcombine.high %v643_v33, %v647_v35  ;;  %v1758_v33 = vcombine.high %v612_v23, %v616_v25  ;;  %v620_v35 = vld [vmem:[#allocation2 + $0x110] sm:$0xff] }
 0x11f   : > { %v452_v5 = vmax.f32 %v442_v0, 0.0  ;;  %1087 = vmatprep.subr.bf16.mxu1 %v1740_v58  ;;  %v1772_v21 = vcombine.high %v627_v18, %v631_v19  ;;  %v1771_v22 = vcombine.low %v627_v18, %v631_v19  ;;  %v1743_v18 = vcombine.low %v597_v61, %v601_v62 }
 0x120   : > { %v450_v7 = vmax.f32 %v434_v3, 0.0  ;;  %v1766_v41 = vcombine.high %v620_v35, %v624_v36 }
 0x121   : > { %v456_v10 = vpack.c.bf16 %v452_v5, %v451_v63  ;;  %v1744_v5 = vcombine.high %v597_v61, %v601_v62  ;;  %v648_v61 = vld [vmem:[#allocation2 + $0x1f0] sm:$0xff]  ;;  %v645_v62 = vld [vmem:[#allocation2 + $0x1d8] sm:$0xff] }
 0x122   : > { %v455_v11 = vpack.c.bf16 %v450_v7, %v449_v2  ;;  %1088 = vmatpush1.bf16.msra.mxu1 %v1739_v4  ;;  %v1742_v4 = vcombine.high %v596_v57, %v600_v60 }
 0x123   : > { %1089 = vmatprep.subr.bf16.mxu1 %v1748_v6  ;;  %v604_v6 = vld [vmem:[#allocation2 + $0x90] sm:$0xff] }
 0x124   : > { %1835 = vmatprep.mubr.msk.bf16.mxu1 %vm496_vm2, %v455_v11  ;;  %v609_v11 = vld [vmem:[#allocation2 + $0xb8] sm:$0xff] }
 0x125   : > { %1836 = vmatmul.mubr.msk.bf16.gmra.mrb[4].mxu1 %vm496_vm2, %v456_v10  ;;  %v605_v10 = vld [vmem:[#allocation2 + $0x98] sm:$0xff] }
 0x126   : > { %1090 = vmatpush1.bf16.msra.mxu1 %v1747_v13  ;;  %1117 = vmatprep.mubr.bf16.mxu1 %v2034_v44  ;;  %v1751_v31 = vcombine.low %v605_v10, %v609_v11 }
 0x127   : > { %1091 = vmatprep.subr.bf16.mxu1 %v1756_v14 }
 0x12a   : > { %1092 = vmatpush1.bf16.msra.mxu1 %v1755_v12 }
 0x12b   : > { %1093 = vmatprep.subr.bf16.mxu1 %v1764_v15  ;;  %v1741_v15 = vcombine.low %v596_v57, %v600_v60  ;;  %v644_v60 = vld [vmem:[#allocation2 + $0x1d0] sm:$0xff] }
 0x12e   : > { %1094 = vmatpush1.bf16.msra.mxu1 %v1763_v20 }
 0x12f   : > { %1095 = vmatprep.subr.bf16.mxu1 %v1772_v21  ;;  %v1750_v21 = vcombine.high %v604_v6, %v608_v9 }
 0x132   : > { %1096 = vmatpush1.bf16.msra.mxu1 %v1771_v22  ;;  %v1752_v22 = vcombine.high %v605_v10, %v609_v11  ;;  %v2262_v10 = vld [vmem:[%s2434_s6] sm:$0xff] }
 0x133   : > { %1097 = vmatprep.subr.bf16.mxu1 %v1780_v30  ;;  %v1749_v30 = vcombine.low %v604_v6, %v608_v9  ;;  %v1789_v6 = vcombine.low %v644_v60, %v648_v61 }
 0x136   : > { %1098 = vmatpush1.bf16.msra.mxu1 %v1779_v29 }
 0x137   : > { %1099 = vmatprep.subr.bf16.mxu1 %v1788_v38  ;;  %v625_v38 = vld [vmem:[#allocation2 + $0x138] sm:$0xff] }
 0x13a   : > { %1100 = vmatpush1.bf16.msra.mxu1 %v1787_v37  ;;  %v621_v37 = vld [vmem:[#allocation2 + $0x118] sm:$0xff] }
 0x13b   : > { %1231 = vmatprep.subr.bf16.mxu1 %v1736_v47  ;;  %v1768_v42 = vcombine.high %v621_v37, %v625_v38  ;;  %v633_v47 = vld [vmem:[#allocation2 + $0x178] sm:$0xff] }
 0x1f0   : > { %v1833_v49 = vpop.f32.mrb[0].mxu1 }
 0x1f1   : > { %v552_v50 = vadd.f32 %v1833_v49, %v1720_v48  ;;  %v543_v51 = vpop.f32.mrb[1].mxu1  ;;  %v1767_v49 = vcombine.low %v621_v37, %v625_v38 }
 0x1f2   : > { %v544_v52 = vadd.f32 %v1720_v48, %v543_v51  ;;  %v1834_v53 = vpop.f32.mrb[2].mxu1 }
 0x1f3   : > { %v555_v54 = vadd.f32 %v1834_v53, %v1720_v48  ;;  %v546_v55 = vpop.f32.mrb[3].mxu1  ;;  %v576_v58 = vmax.f32 %v552_v50, 0.0  ;;  %v640_v53 = vld [vmem:[#allocation2 + $0x1b0] sm:$0xff] }
 0x1f4   : > { %v547_v56 = vadd.f32 %v1720_v48, %v546_v55  ;;  %v574_v63 = vmax.f32 %v544_v52, 0.0  ;;  %v636_v52 = vld [vmem:[#allocation2 + $0x190] sm:$0xff]  ;;  %v641_v55 = vld [vmem:[#allocation2 + $0x1b8] sm:$0xff] }
 0x1f5   : > { %v577_v59 = vmax.f32 %v555_v54, 0.0  ;;  %v637_v54 = vld [vmem:[#allocation2 + $0x198] sm:$0xff] }
 0x1f6   : > { %v575_v0 = vmax.f32 %v547_v56, 0.0 }
 0x1f7   : > { %v2217_v1 = vpack.c.bf16 %v577_v59, %v576_v58  ;;  %v1782_v58 = vcombine.high %v636_v52, %v640_v53  ;;  %v1784_v59 = vcombine.high %v637_v54, %v641_v55 }
 0x1f8   : > { %v2219_v2 = vpack.c.bf16 %v575_v0, %v574_v63  ;;  %v1837_v3 = vpop.f32.mrb[4].mxu1  ;;  %v649_v63 = vld [vmem:[#allocation2 + $0x1f8] sm:$0xff]  ;;  %v1781_v0 = vcombine.low %v636_v52, %v640_v53 }
 0x1f9   : > { %v568_v7 = vadd.f32 %v1837_v3, %v1720_v48  ;;  %v559_v8 = vpop.f32.mrb[5].mxu1  ;;  %v1783_v3 = vcombine.low %v637_v54, %v641_v55 }
 0x1fa   : > { %v560_v13 = vadd.f32 %v1720_v48, %v559_v8  ;;  %1045 = vmatmul.mubr.bf16.vlgmr.msra.gmra.mrb[8].mxu0 %v2219_v2  ;;  %1118 = vmatmul.mubr.bf16.vlgmr.msra.gmra.mrb[8].mxu1 %v2219_v2  ;;  %v1838_v14 = vpop.f32.mrb[6].mxu1 }
 0x1fb   : > { %v580_v16 = vmax.f32 %v568_v7, 0.0  ;;  %1159 = vmatpush1.bf16.msra.mxu0 %v1733_v45  ;;  %1232 = vmatpush1.bf16.msra.mxu1 %v1735_v46  ;;  %v571_v17 = vadd.f32 %v1838_v14, %v1720_v48  ;;  %v562_v12 = vpop.f32.mrb[7].mxu1  ;;  %v632_v45 = vld [vmem:[#allocation2 + $0x170] sm:$0xff]  ;;  %v629_v46 = vld [vmem:[#allocation2 + $0x158] sm:$0xff]  ;;  %v1791_v7 = vcombine.low %v645_v62, %v649_v63 }
 0x1fc   : > { %v578_v19 = vmax.f32 %v560_v13, 0.0  ;;  %v563_v20 = vadd.f32 %v1720_v48, %v562_v12  ;;  %1160 = vmatprep.subr.bf16.mxu0 %v1742_v4  ;;  %1233 = vmatprep.subr.bf16.mxu1 %v1744_v5  ;;  %v1765_v48 = vcombine.low %v620_v35, %v624_v36  ;;  %v1774_v50 = vcombine.high %v628_v43, %v632_v45 }
 0x1fd   : > { %v581_v24 = vmax.f32 %v571_v17, 0.0  ;;  %1054 = vmatprep.mubr.bf16.mxu0 %v2034_v44  ;;  %1127 = vmatprep.mubr.bf16.mxu1 %v2034_v44  ;;  %v1776_v51 = vcombine.high %v629_v46, %v633_v47  ;;  %v1773_v56 = vcombine.low %v628_v43, %v632_v45  ;;  %v1775_v57 = vcombine.low %v629_v46, %v633_v47 }
 0x1fe   : > { %v579_v28 = vmax.f32 %v563_v20, 0.0  ;;  %v1790_v4 = vcombine.high %v644_v60, %v648_v61  ;;  %v1792_v5 = vcombine.high %v645_v62, %v649_v63 }
 0x1ff   : > { %v2225_v29 = vpack.c.bf16 %v581_v24, %v580_v16  ;;  %1161 = vmatpush1.bf16.msra.mxu0 %v1741_v15  ;;  %1234 = vmatpush1.bf16.msra.mxu1 %v1743_v18 }
 0x200   : > { %v2227_v32 = vpack.c.bf16 %v579_v28, %v578_v19  ;;  %1162 = vmatprep.subr.bf16.mxu0 %v1750_v21  ;;  %1235 = vmatprep.subr.bf16.mxu1 %v1752_v22 }
 0x202   : > { %1055 = vmatmul.mubr.bf16.gmra.mrb[12].mxu0 %v2217_v1  ;;  %1128 = vmatmul.mubr.bf16.gmra.mrb[12].mxu1 %v2217_v1 }
 0x203   : > { %1163 = vmatpush1.bf16.msra.mxu0 %v1749_v30  ;;  %1236 = vmatpush1.bf16.msra.mxu1 %v1751_v31 }
 0x204   : > { %1164 = vmatprep.subr.bf16.mxu0 %v1758_v33  ;;  %1237 = vmatprep.subr.bf16.mxu1 %v1760_v34 }
 0x205   : > { %1064 = vmatprep.mubr.bf16.mxu0 %v2034_v44  ;;  %1137 = vmatprep.mubr.bf16.mxu1 %v2034_v44 }
 0x207   : > { %1165 = vmatpush1.bf16.msra.mxu0 %v1757_v39  ;;  %1238 = vmatpush1.bf16.msra.mxu1 %v1759_v40 }
 0x208   : > { %1166 = vmatprep.subr.bf16.mxu0 %v1766_v41  ;;  %1239 = vmatprep.subr.bf16.mxu1 %v1768_v42 }
 0x20a   : > { %1065 = vmatmul.mubr.bf16.gmra.mrb[16].mxu0 %v2227_v32  ;;  %1138 = vmatmul.mubr.bf16.gmra.mrb[16].mxu1 %v2227_v32 }
 0x20b   : > { %1167 = vmatpush1.bf16.msra.mxu0 %v1765_v48  ;;  %1240 = vmatpush1.bf16.msra.mxu1 %v1767_v49 }
 0x20c   : > { %1168 = vmatprep.subr.bf16.mxu0 %v1774_v50  ;;  %1241 = vmatprep.subr.bf16.mxu1 %v1776_v51 }
 0x20d   : > { %1074 = vmatprep.mubr.bf16.mxu0 %v2034_v44  ;;  %1147 = vmatprep.mubr.bf16.mxu1 %v2034_v44 }
 0x20f   : > { %1169 = vmatpush1.bf16.msra.mxu0 %v1773_v56  ;;  %1242 = vmatpush1.bf16.msra.mxu1 %v1775_v57 }
 0x210   : > { %1170 = vmatprep.subr.bf16.mxu0 %v1782_v58  ;;  %1243 = vmatprep.subr.bf16.mxu1 %v1784_v59 }
 0x212   : > { %1075 = vmatmul.mubr.bf16.gmra.mrb[20].mxu0 %v2225_v29  ;;  %1148 = vmatmul.mubr.bf16.gmra.mrb[20].mxu1 %v2225_v29 }
 0x213   : > { %1171 = vmatpush1.bf16.msra.mxu0 %v1781_v0  ;;  %1244 = vmatpush1.bf16.msra.mxu1 %v1783_v3 }
 0x214   : > { %1172 = vmatprep.subr.bf16.mxu0 %v1790_v4  ;;  %1245 = vmatprep.subr.bf16.mxu1 %v1792_v5 }
 0x215   : > { %1190 = vmatprep.mubr.bf16.mxu0 %v2034_v44  ;;  %1263 = vmatprep.mubr.bf16.mxu1 %v2034_v44 }
 0x217   : > { %1173 = vmatpush1.bf16.msra.mxu0 %v1789_v6  ;;  %1246 = vmatpush1.bf16.msra.mxu1 %v1791_v7 }
 0x21a   : > { %1191 = vmatmul.mubr.bf16.vlgmr.msra.gmra.mrb[24].mxu0 %v2219_v2  ;;  %1264 = vmatmul.mubr.bf16.vlgmr.msra.gmra.mrb[24].mxu1 %v2219_v2  ;;  %v652_v2 = vlaneseq }
 0x21b   : > { %1200 = vmatprep.mubr.bf16.mxu0 %v2034_v44  ;;  %1273 = vmatprep.mubr.bf16.mxu1 %v2034_v44 }
 0x21c   : > { %v2255_v8 = vshrl.u32 %v652_v2, 7 }
 0x21e   : > { %v662_v9 = vsub.s32 2, %v2255_v8  ;;  %v658_v11 = vsub.s32 1, %v2255_v8 }
 0x220   : > { %v2270_v14 = vrot.slane %v2262_v10, %v662_v9  ;;  %v2273_v16 = vrot.slane %v2262_v10, %v658_v11 }
 0x222   : > { %1201 = vmatmul.mubr.bf16.gmra.mrb[28].mxu0 %v2217_v1  ;;  %1274 = vmatmul.mubr.bf16.gmra.mrb[28].mxu1 %v2217_v1  ;;  %v654_v1 = vsub.s32 0, %v2255_v8 }
 0x223   : > { %1210 = vmatprep.mubr.bf16.mxu0 %v2034_v44  ;;  %1283 = vmatprep.mubr.bf16.mxu1 %v2034_v44 }
 0x224   : > { %v2267_v13 = vrot.slane %v2262_v10, %v654_v1 }
 0x22a   : > { %1211 = vmatmul.mubr.bf16.gmra.mrb[32].mxu0 %v2227_v32  ;;  %1284 = vmatmul.mubr.bf16.gmra.mrb[32].mxu1 %v2227_v32 }
 0x22b   : > { %1220 = vmatprep.mubr.bf16.mxu0 %v2034_v44  ;;  %1293 = vmatprep.mubr.bf16.mxu1 %v2034_v44  ;;  %v666_v44 = vsub.s32 3, %v2255_v8 }
 0x22d   : > { %v2276_v17 = vrot.slane %v2262_v10, %v666_v44 }
 0x232   : > { %1221 = vmatmul.mubr.bf16.gmra.mrb[36].mxu0 %v2225_v29  ;;  %1294 = vmatmul.mubr.bf16.gmra.mrb[36].mxu1 %v2225_v29 }
 0x2cd   : > { %v1046_v12 = vpop.f32.mrb[8].mxu0  ;;  %v1119_v15 = vpop.f32.mrb[8].mxu1 }
 0x2ce   : > { %v1047_v18 = vadd.f32 %v1046_v12, %v2267_v13  ;;  %v1120_v19 = vadd.f32 %v1119_v15, %v2270_v14  ;;  %v1048_v20 = vpop.f32.mrb[9].mxu0  ;;  %v1121_v21 = vpop.f32.mrb[9].mxu1 }
 0x2cf   : > { %v1049_v22 = vadd.f32 %v1048_v20, %v2273_v16  ;;  %v1122_v23 = vadd.f32 %v1121_v21, %v2276_v17  ;;  %v1050_v24 = vpop.f32.mrb[10].mxu0  ;;  %v1123_v25 = vpop.f32.mrb[10].mxu1  ;;  %v670_v20 = vsub.s32 4, %v2255_v8 }
 0x2d0   : > { %v1051_v26 = vadd.f32 %v1050_v24, %v2267_v13  ;;  %v1124_v27 = vadd.f32 %v1123_v25, %v2270_v14  ;;  %v1052_v28 = vpop.f32.mrb[11].mxu0  ;;  %v1125_v29 = vpop.f32.mrb[11].mxu1  ;;  %v1304_v32 = vmax.f32 %v1047_v18, 0.0  ;;  %v1306_v33 = vmax.f32 %v1120_v19, 0.0 }
 0x2d1   : > { %v1053_v30 = vadd.f32 %v1052_v28, %v2273_v16  ;;  %v1126_v31 = vadd.f32 %v1125_v29, %v2276_v17  ;;  %v1305_v36 = vmax.f32 %v1049_v22, 0.0  ;;  %v1307_v37 = vmax.f32 %v1122_v23, 0.0 }
 0x2d2   : > { %v1312_v34 = vmax.f32 %v1051_v26, 0.0  ;;  %v1314_v35 = vmax.f32 %v1124_v27, 0.0  ;;  %v678_v25 = vsub.s32 6, %v2255_v8  ;;  %v674_v26 = vsub.s32 5, %v2255_v8 }
 0x2d3   : > { %v1313_v38 = vmax.f32 %v1053_v30, 0.0  ;;  %v1315_v39 = vmax.f32 %v1126_v31, 0.0  ;;  %v2035_v31 = vmov 1966171168  }
 0x2d4   : > { %v1368_v40 = vmax.f32 %v1304_v32, %v1312_v34  ;;  %v1394_v41 = vmax.f32 %v1306_v33, %v1314_v35  ;;  %v1489_v32 = vunpack.c.l.s4 %v2035_v31  ;;  %v682_v33 = vsub.s32 7, %v2255_v8 }
 0x2d5   : > { %v1381_v42 = vmax.f32 %v1305_v36, %v1313_v38  ;;  %v1407_v43 = vmax.f32 %v1307_v37, %v1315_v39  ;;  %v1056_v45 = vpop.f32.mrb[12].mxu0  ;;  %v1129_v46 = vpop.f32.mrb[12].mxu1 }
 0x2d6   : > { %v1057_v47 = vadd.f32 %v1056_v45, %v2267_v13  ;;  %v1130_v48 = vadd.f32 %v1129_v46, %v2270_v14  ;;  %v1058_v49 = vpop.f32.mrb[13].mxu0  ;;  %v1131_v50 = vpop.f32.mrb[13].mxu1 }
 0x2d7   : > { %v1059_v51 = vadd.f32 %v1058_v49, %v2273_v16  ;;  %v1132_v52 = vadd.f32 %v1131_v50, %v2276_v17  ;;  %v1060_v53 = vpop.f32.mrb[14].mxu0  ;;  %v1133_v54 = vpop.f32.mrb[14].mxu1 }
 0x2d8   : > { %v1320_v55 = vmax.f32 %v1057_v47, 0.0  ;;  %v1322_v56 = vmax.f32 %v1130_v48, 0.0  ;;  %v1061_v57 = vadd.f32 %v1060_v53, %v2267_v13  ;;  %v1134_v58 = vadd.f32 %v1133_v54, %v2270_v14  ;;  %v1062_v59 = vpop.f32.mrb[15].mxu0  ;;  %v1135_v60 = vpop.f32.mrb[15].mxu1 }
 0x2d9   : > { %v1321_v61 = vmax.f32 %v1059_v51, 0.0  ;;  %v1323_v62 = vmax.f32 %v1132_v52, 0.0  ;;  %v1063_v63 = vadd.f32 %v1062_v59, %v2273_v16  ;;  %v1136_v0 = vadd.f32 %v1135_v60, %v2276_v17 }
 0x2da   : > { %v1369_v3 = vmax.f32 %v1368_v40, %v1320_v55  ;;  %v1395_v4 = vmax.f32 %v1394_v41, %v1322_v56  ;;  %v1328_v5 = vmax.f32 %v1061_v57, 0.0  ;;  %v1330_v6 = vmax.f32 %v1134_v58, 0.0 }
 0x2db   : > { %v1382_v7 = vmax.f32 %v1381_v42, %v1321_v61  ;;  %v1408_v2 = vmax.f32 %v1407_v43, %v1323_v62  ;;  %v1329_v1 = vmax.f32 %v1063_v63, 0.0  ;;  %v1331_v9 = vmax.f32 %v1136_v0, 0.0 }
 0x2dc   : > { %v1370_v11 = vmax.f32 %v1369_v3, %v1328_v5  ;;  %v1396_v44 = vmax.f32 %v1395_v4, %v1330_v6  ;;  %v2307_v59 = vrot.slane %v2262_v10, %v670_v20  ;;  %v2312_v0 = vrot.slane %v2262_v10, %v678_v25 }
 0x2dd   : > { %v1383_v12 = vmax.f32 %v1382_v7, %v1329_v1  ;;  %v1409_v15 = vmax.f32 %v1408_v2, %v1331_v9  ;;  %v1066_v18 = vpop.f32.mrb[16].mxu0  ;;  %v1139_v19 = vpop.f32.mrb[16].mxu1  ;;  %v2315_v3 = vrot.slane %v2262_v10, %v674_v26  ;;  %v1490_v2 = vunpack.c.0.s8 %v1489_v32 }
 0x2de   : > { %v1067_v21 = vadd.f32 %v1066_v18, %v2267_v13  ;;  %v1140_v22 = vadd.f32 %v1139_v19, %v2270_v14  ;;  %v1068_v23 = vpop.f32.mrb[17].mxu0  ;;  %v1141_v24 = vpop.f32.mrb[17].mxu1  ;;  %v2320_v1 = vrot.slane %v2262_v10, %v682_v33 }
 0x2df   : > { %v1069_v27 = vadd.f32 %v1068_v23, %v2273_v16  ;;  %v1142_v28 = vadd.f32 %v1141_v24, %v2276_v17  ;;  %v1070_v29 = vpop.f32.mrb[18].mxu0  ;;  %v1143_v30 = vpop.f32.mrb[18].mxu1 }
 0x2e0   : > { %v1336_v34 = vmax.f32 %v1067_v21, 0.0  ;;  %v1338_v35 = vmax.f32 %v1140_v22, 0.0  ;;  %v1071_v36 = vadd.f32 %v1070_v29, %v2267_v13  ;;  %v1144_v37 = vadd.f32 %v1143_v30, %v2270_v14  ;;  %v1072_v38 = vpop.f32.mrb[19].mxu0  ;;  %v1145_v39 = vpop.f32.mrb[19].mxu1 }
 0x2e1   : > { %v1337_v40 = vmax.f32 %v1069_v27, 0.0  ;;  %v1339_v41 = vmax.f32 %v1142_v28, 0.0  ;;  %v1073_v42 = vadd.f32 %v1072_v38, %v2273_v16  ;;  %v1146_v43 = vadd.f32 %v1145_v39, %v2276_v17 }
 0x2e2   : > { %v1371_v45 = vmax.f32 %v1370_v11, %v1336_v34  ;;  %v1397_v46 = vmax.f32 %v1396_v44, %v1338_v35  ;;  %v1344_v47 = vmax.f32 %v1071_v36, 0.0  ;;  %v1346_v48 = vmax.f32 %v1144_v37, 0.0 }
 0x2e3   : > { %v1384_v49 = vmax.f32 %v1383_v12, %v1337_v40  ;;  %v1410_v50 = vmax.f32 %v1409_v15, %v1339_v41  ;;  %v1345_v51 = vmax.f32 %v1073_v42, 0.0  ;;  %v1347_v52 = vmax.f32 %v1146_v43, 0.0 }
 0x2e4   : > { %v1372_v53 = vmax.f32 %v1371_v45, %v1344_v47  ;;  %v1398_v54 = vmax.f32 %v1397_v46, %v1346_v48 }
 0x2e5   : > { %v1385_v55 = vmax.f32 %v1384_v49, %v1345_v51  ;;  %v1411_v56 = vmax.f32 %v1410_v50, %v1347_v52  ;;  %v1076_v57 = vpop.f32.mrb[20].mxu0  ;;  %v1149_v58 = vpop.f32.mrb[20].mxu1 }
 0x2e6   : > { %v1077_v60 = vadd.f32 %v1076_v57, %v2267_v13  ;;  %v1150_v61 = vadd.f32 %v1149_v58, %v2270_v14  ;;  %v1078_v62 = vpop.f32.mrb[21].mxu0  ;;  %v1151_v63 = vpop.f32.mrb[21].mxu1 }
 0x2e7   : > { %v1079_v4 = vadd.f32 %v1078_v62, %v2273_v16  ;;  %v1152_v5 = vadd.f32 %v1151_v63, %v2276_v17  ;;  %v1080_v6 = vpop.f32.mrb[22].mxu0  ;;  %v1153_v7 = vpop.f32.mrb[22].mxu1 }
 0x2e8   : > { %v1352_v9 = vmax.f32 %v1077_v60, 0.0  ;;  %v1354_v11 = vmax.f32 %v1150_v61, 0.0  ;;  %v1081_v44 = vadd.f32 %v1080_v6, %v2267_v13  ;;  %v1154_v12 = vadd.f32 %v1153_v7, %v2270_v14  ;;  %v1082_v15 = vpop.f32.mrb[23].mxu0  ;;  %v1155_v18 = vpop.f32.mrb[23].mxu1 }
 0x2e9   : > { %v1353_v19 = vmax.f32 %v1079_v4, 0.0  ;;  %v1355_v20 = vmax.f32 %v1152_v5, 0.0  ;;  %v1083_v21 = vadd.f32 %v1082_v15, %v2273_v16  ;;  %v1156_v22 = vadd.f32 %v1155_v18, %v2276_v17 }
 0x2ea   : > { %v1373_v23 = vmax.f32 %v1372_v53, %v1352_v9  ;;  %v1399_v24 = vmax.f32 %v1398_v54, %v1354_v11  ;;  %v1360_v25 = vmax.f32 %v1081_v44, 0.0  ;;  %v1362_v26 = vmax.f32 %v1154_v12, 0.0 }
 0x2eb   : > { %v1386_v10 = vmax.f32 %v1385_v55, %v1353_v19  ;;  %v1412_v27 = vmax.f32 %v1411_v56, %v1355_v20  ;;  %v1361_v28 = vmax.f32 %v1083_v21, 0.0  ;;  %v1363_v29 = vmax.f32 %v1156_v22, 0.0 }
 0x2ec   : > { %v1374_v30 = vmax.f32 %v1373_v23, %v1360_v25  ;;  %v1400_v13 = vmax.f32 %v1399_v24, %v1362_v26  ;;  %v2327_v14 = vsub.s32 %v1490_v2, %v2255_v8 }
 0x2ed   : > { %v1387_v31 = vmax.f32 %v1386_v10, %v1361_v28  ;;  %v1413_v32 = vmax.f32 %v1412_v27, %v1363_v29  ;;  %v1192_v33 = vpop.f32.mrb[24].mxu0  ;;  %v1265_v34 = vpop.f32.mrb[24].mxu1 }
 0x2ee   : > { %v1375_v16 = vrot.slane %v1374_v30, 4  ;;  %v1401_v35 = vrot.slane %v1400_v13, 4  ;;  %v1193_v17 = vadd.f32 %v1192_v33, %v2307_v59  ;;  %v1266_v36 = vadd.f32 %v1265_v34, %v2312_v0  ;;  %v1194_v37 = vpop.f32.mrb[25].mxu0  ;;  %v1267_v38 = vpop.f32.mrb[25].mxu1 }
 0x2ef   : > { %v1388_v39 = vrot.slane %v1387_v31, 4  ;;  %v1414_v40 = vrot.slane %v1413_v32, 4  ;;  %v1195_v41 = vadd.f32 %v1194_v37, %v2315_v3  ;;  %v1268_v42 = vadd.f32 %v1267_v38, %v2320_v1  ;;  %v1196_v43 = vpop.f32.mrb[26].mxu0  ;;  %v1269_v8 = vpop.f32.mrb[26].mxu1 }
 0x2f0   : > { %v1376_v45 = vmax.f32 %v1374_v30, %v1375_v16  ;;  %v1402_v46 = vmax.f32 %v1400_v13, %v1401_v35  ;;  %v1308_v47 = vmax.f32 %v1193_v17, 0.0  ;;  %v1310_v48 = vmax.f32 %v1266_v36, 0.0  ;;  %v1198_v49 = vpop.f32.mrb[27].mxu0  ;;  %v1271_v50 = vpop.f32.mrb[27].mxu1 }
 0x2f1   : > { %v1389_v51 = vmax.f32 %v1387_v31, %v1388_v39  ;;  %v1415_v52 = vmax.f32 %v1413_v32, %v1414_v40  ;;  %v1309_v53 = vmax.f32 %v1195_v41, 0.0  ;;  %v1311_v54 = vmax.f32 %v1268_v42, 0.0 }
 0x2f2   : > { %v1377_v55 = vrot.slane %v1376_v45, 2  ;;  %v1403_v56 = vrot.slane %v1402_v46, 2  ;;  %v1197_v57 = vadd.f32 %v1196_v43, %v2307_v59  ;;  %v1270_v58 = vadd.f32 %v1269_v8, %v2312_v0 }
 0x2f3   : > { %v1390_v60 = vrot.slane %v1389_v51, 2  ;;  %v1416_v61 = vrot.slane %v1415_v52, 2  ;;  %v1199_v62 = vadd.f32 %v1198_v49, %v2315_v3  ;;  %v1272_v63 = vadd.f32 %v1271_v50, %v2320_v1 }
 0x2f4   : > { %v1378_v4 = vmax.f32 %v1376_v45, %v1377_v55  ;;  %v1404_v5 = vmax.f32 %v1402_v46, %v1403_v56  ;;  %v1316_v6 = vmax.f32 %v1197_v57, 0.0  ;;  %v1318_v7 = vmax.f32 %v1270_v58, 0.0 }
 0x2f5   : > { %v1391_v2 = vmax.f32 %v1389_v51, %v1390_v60  ;;  %v1417_v9 = vmax.f32 %v1415_v52, %v1416_v61  ;;  %v1317_v11 = vmax.f32 %v1199_v62, 0.0  ;;  %v1319_v44 = vmax.f32 %v1272_v63, 0.0  ;;  %v1202_v12 = vpop.f32.mrb[28].mxu0  ;;  %v1275_v15 = vpop.f32.mrb[28].mxu1 }
 0x2f6   : > { %v1379_v18 = vrot.slane %v1378_v4, 1  ;;  %v1405_v19 = vrot.slane %v1404_v5, 1  ;;  %v1420_v20 = vmax.f32 %v1308_v47, %v1316_v6  ;;  %v1446_v21 = vmax.f32 %v1310_v48, %v1318_v7  ;;  %v1204_v22 = vpop.f32.mrb[29].mxu0  ;;  %v1277_v23 = vpop.f32.mrb[29].mxu1 }
 0x2f7   : > { %v1392_v24 = vrot.slane %v1391_v2, 1  ;;  %v1418_v25 = vrot.slane %v1417_v9, 1  ;;  %v1433_v26 = vmax.f32 %v1309_v53, %v1317_v11  ;;  %v1459_v10 = vmax.f32 %v1311_v54, %v1319_v44  ;;  %v1206_v27 = vpop.f32.mrb[30].mxu0  ;;  %v1279_v28 = vpop.f32.mrb[30].mxu1 }
 0x2f8   : > { %v1380_v29 = vmax.f32 %v1378_v4, %v1379_v18  ;;  %v1406_v30 = vmax.f32 %v1404_v5, %v1405_v19  ;;  %v1203_v13 = vadd.f32 %v1202_v12, %v2307_v59  ;;  %v1276_v31 = vadd.f32 %v1275_v15, %v2312_v0  ;;  %v1208_v32 = vpop.f32.mrb[31].mxu0  ;;  %v1281_v33 = vpop.f32.mrb[31].mxu1 }
 0x2f9   : > { %v1393_v34 = vmax.f32 %v1391_v2, %v1392_v24  ;;  %v1419_v16 = vmax.f32 %v1417_v9, %v1418_v25  ;;  %v1205_v35 = vadd.f32 %v1204_v22, %v2315_v3  ;;  %v1278_v17 = vadd.f32 %v1277_v23, %v2320_v1 }
 0x2fa   : > { %v1324_v36 = vmax.f32 %v1203_v13, 0.0  ;;  %v1326_v37 = vmax.f32 %v1276_v31, 0.0  ;;  %v1207_v38 = vadd.f32 %v1206_v27, %v2307_v59  ;;  %v1280_v39 = vadd.f32 %v1279_v28, %v2312_v0 }
 0x2fb   : > { %v1484_v40 = vcombine.low %v1380_v29, %v1393_v34  ;;  %v1485_v41 = vcombine.low %v1406_v30, %v1419_v16  ;;  %v1325_v42 = vmax.f32 %v1205_v35, 0.0  ;;  %v1327_v43 = vmax.f32 %v1278_v17, 0.0 }
 0x2fc   : > { %v1421_v8 = vmax.f32 %v1420_v20, %v1324_v36  ;;  %v1447_v45 = vmax.f32 %v1446_v21, %v1326_v37  ;;  %v1332_v46 = vmax.f32 %v1207_v38, 0.0  ;;  %v1334_v47 = vmax.f32 %v1280_v39, 0.0 }
 0x2fd   : > { %v2344_v48 = vrot.slane %v1484_v40, %v2327_v14  ;;  %v2347_v49 = vrot.slane %v1485_v41, %v2327_v14  ;;  %v1434_v50 = vmax.f32 %v1433_v26, %v1325_v42  ;;  %v1460_v51 = vmax.f32 %v1459_v10, %v1327_v43  ;;  %v1212_v52 = vpop.f32.mrb[32].mxu0  ;;  %v1285_v53 = vpop.f32.mrb[32].mxu1 }
 0x2fe   : > { %v1422_v54 = vmax.f32 %v1421_v8, %v1332_v46  ;;  %v1448_v55 = vmax.f32 %v1447_v45, %v1334_v47  ;;  %v1209_v56 = vadd.f32 %v1208_v32, %v2315_v3  ;;  %v1282_v57 = vadd.f32 %v1281_v33, %v2320_v1  ;;  %v1214_v58 = vpop.f32.mrb[33].mxu0  ;;  %v1287_v60 = vpop.f32.mrb[33].mxu1 }
 0x2ff   : > { %v1213_v61 = vadd.f32 %v1212_v52, %v2307_v59  ;;  %v1286_v62 = vadd.f32 %v1285_v53, %v2312_v0  ;;  %v1215_v63 = vadd.f32 %v1214_v58, %v2315_v3  ;;  %v1288_v4 = vadd.f32 %v1287_v60, %v2320_v1  ;;  %v1216_v5 = vpop.f32.mrb[34].mxu0  ;;  %v1289_v6 = vpop.f32.mrb[34].mxu1 }
 0x300   : > { %v1333_v7 = vmax.f32 %v1209_v56, 0.0  ;;  %v1335_v2 = vmax.f32 %v1282_v57, 0.0  ;;  %v1217_v9 = vadd.f32 %v1216_v5, %v2307_v59  ;;  %v1290_v11 = vadd.f32 %v1289_v6, %v2312_v0  ;;  %v1218_v44 = vpop.f32.mrb[35].mxu0  ;;  %v1291_v12 = vpop.f32.mrb[35].mxu1 }
 0x301   : > { %v1340_v15 = vmax.f32 %v1213_v61, 0.0  ;;  %v1342_v18 = vmax.f32 %v1286_v62, 0.0  ;;  %v1341_v19 = vmax.f32 %v1215_v63, 0.0  ;;  %v1343_v20 = vmax.f32 %v1288_v4, 0.0 }
 0x302   : > { %v1435_v21 = vmax.f32 %v1434_v50, %v1333_v7  ;;  %v1461_v22 = vmax.f32 %v1460_v51, %v1335_v2  ;;  %v1348_v23 = vmax.f32 %v1217_v9, 0.0  ;;  %v1350_v24 = vmax.f32 %v1290_v11, 0.0 }
 0x303   : > { %v1423_v25 = vmax.f32 %v1422_v54, %v1340_v15  ;;  %v1449_v26 = vmax.f32 %v1448_v55, %v1342_v18  ;;  %v1219_v10 = vadd.f32 %v1218_v44, %v2315_v3  ;;  %v1292_v27 = vadd.f32 %v1291_v12, %v2320_v1 }
 0x304   : > { %v1436_v28 = vmax.f32 %v1435_v21, %v1341_v19  ;;  %v1462_v29 = vmax.f32 %v1461_v22, %v1343_v20  ;;  %v1516_v30 = vcombine.low %v2344_v48, %v2347_v49 }
 0x305   : > { %v1424_v13 = vmax.f32 %v1423_v25, %v1348_v23  ;;  %v1450_v31 = vmax.f32 %v1449_v26, %v1350_v24  ;;  %v1349_v32 = vmax.f32 %v1219_v10, 0.0  ;;  %v1351_v33 = vmax.f32 %v1292_v27, 0.0  ;;  %v1222_v34 = vpop.f32.mrb[36].mxu0  ;;  %v1295_v16 = vpop.f32.mrb[36].mxu1 }
 0x306   : > { %v1223_v35 = vadd.f32 %v1222_v34, %v2307_v59  ;;  %v1296_v17 = vadd.f32 %v1295_v16, %v2312_v0  ;;  %v1224_v36 = vpop.f32.mrb[37].mxu0  ;;  %v1297_v37 = vpop.f32.mrb[37].mxu1 }
 0x307   : > { %v1437_v38 = vmax.f32 %v1436_v28, %v1349_v32  ;;  %v1463_v39 = vmax.f32 %v1462_v29, %v1351_v33  ;;  %v1225_v40 = vadd.f32 %v1224_v36, %v2315_v3  ;;  %v1298_v41 = vadd.f32 %v1297_v37, %v2320_v1  ;;  %v1226_v42 = vpop.f32.mrb[38].mxu0  ;;  %v1299_v43 = vpop.f32.mrb[38].mxu1 }
 0x308   : > { %v1356_v8 = vmax.f32 %v1223_v35, 0.0  ;;  %v1358_v45 = vmax.f32 %v1296_v17, 0.0  ;;  %v1227_v46 = vadd.f32 %v1226_v42, %v2307_v59  ;;  %v1300_v47 = vadd.f32 %v1299_v43, %v2312_v0  ;;  %v1228_v50 = vpop.f32.mrb[39].mxu0  ;;  %v1301_v51 = vpop.f32.mrb[39].mxu1 }
 0x309   : > { %v1357_v52 = vmax.f32 %v1225_v40, 0.0  ;;  %v1359_v53 = vmax.f32 %v1298_v41, 0.0  ;;  %v1229_v54 = vadd.f32 %v1228_v50, %v2315_v3  ;;  %v1302_v55 = vadd.f32 %v1301_v51, %v2320_v1 }
 0x30a   : > { %v1425_v56 = vmax.f32 %v1424_v13, %v1356_v8  ;;  %v1451_v57 = vmax.f32 %v1450_v31, %v1358_v45  ;;  %v1364_v58 = vmax.f32 %v1227_v46, 0.0  ;;  %v1366_v60 = vmax.f32 %v1300_v47, 0.0 }
 0x30b   : > { %v1438_v61 = vmax.f32 %v1437_v38, %v1357_v52  ;;  %v1464_v62 = vmax.f32 %v1463_v39, %v1359_v53  ;;  %v1365_v63 = vmax.f32 %v1229_v54, 0.0  ;;  %v1367_v4 = vmax.f32 %v1302_v55, 0.0 }
 0x30c   : > { %v1426_v5 = vmax.f32 %v1425_v56, %v1364_v58  ;;  %v1452_v59 = vmax.f32 %v1451_v57, %v1366_v60  ;;  %v1524_v17 = vrot.slane %v1516_v30, %v2327_v14 }
 0x30d   : > { %v1439_v6 = vmax.f32 %v1438_v61, %v1365_v63  ;;  %v1465_v0 = vmax.f32 %v1464_v62, %v1367_v4 }
 0x30e   : > { %v1427_v7 = vrot.slane %v1426_v5, 4  ;;  %v1453_v2 = vrot.slane %v1452_v59, 4 }
 0x30f   : > { %v1440_v9 = vrot.slane %v1439_v6, 4  ;;  %v1466_v11 = vrot.slane %v1465_v0, 4 }
 0x310   : > { %v1428_v44 = vmax.f32 %v1426_v5, %v1427_v7  ;;  %v1454_v3 = vmax.f32 %v1452_v59, %v1453_v2 }
 0x311   : > { %v1441_v1 = vmax.f32 %v1439_v6, %v1440_v9  ;;  %v1467_v12 = vmax.f32 %v1465_v0, %v1466_v11 }
 0x312   : > { %v1429_v15 = vrot.slane %v1428_v44, 2  ;;  %v1455_v18 = vrot.slane %v1454_v3, 2 }
 0x313   : > { %v1442_v19 = vrot.slane %v1441_v1, 2  ;;  %v1468_v20 = vrot.slane %v1467_v12, 2 }
 0x314   : > { %v1430_v21 = vmax.f32 %v1428_v44, %v1429_v15  ;;  %v1456_v22 = vmax.f32 %v1454_v3, %v1455_v18 }
 0x315   : > { %v1443_v23 = vmax.f32 %v1441_v1, %v1442_v19  ;;  %v1469_v24 = vmax.f32 %v1467_v12, %v1468_v20 }
 0x316   : > { %v1431_v25 = vrot.slane %v1430_v21, 1  ;;  %v1457_v26 = vrot.slane %v1456_v22, 1 }
 0x317   : > { %v1444_v10 = vrot.slane %v1443_v23, 1  ;;  %v1470_v27 = vrot.slane %v1469_v24, 1 }
 0x318   : > { %v1432_v28 = vmax.f32 %v1430_v21, %v1431_v25  ;;  %v1458_v29 = vmax.f32 %v1456_v22, %v1457_v26 }
 0x319   : > { %v1445_v13 = vmax.f32 %v1443_v23, %v1444_v10  ;;  %v1471_v31 = vmax.f32 %v1469_v24, %v1470_v27 }
 0x31b   : > { %v1486_v32 = vcombine.low %v1432_v28, %v1445_v13  ;;  %v1487_v33 = vcombine.low %v1458_v29, %v1471_v31 }
 0x31d   : > { %v1508_v34 = vrot.slane %v1486_v32, %v2327_v14  ;;  %v1515_v16 = vrot.slane %v1487_v33, %v2327_v14 }
 0x31f   : > { %v1517_v35 = vcombine.low %v1508_v34, %v1515_v16 }
 0x321   : > { %v1531_v36 = vrot.slane %v1517_v35, %v2327_v14 }
 0x323   : > { %v1532_v37 = vcombine.low %v1524_v17, %v1531_v36 }
 0x325   : > { %1534 = vst [vmem:[%s309_s21] sm:$0xff] %v1532_v37 }
 0x326   : > { %1960 = shalt.err (!%p1957_p6)
}
 0x327   : > { %s1961_s16 = scalar_lea.hbm %s2381_s8, 128  ;;  %s1965_s20 = scalar_lea.hbm %s2435_s7, 256 }
 0x328   : > { %p1962_p7 = scmp.ne.s32.totalorder %s2381_s8, %s1961_s16  ;;  %p1966_p0 = scmp.lt.u32.totalorder %s2381_s8, %s2435_s7 }
 0x329   : > { %p1967_p2 = scmp.lt.u32.totalorder %s1965_s20, %s1961_s16  ;;  %p1969_p8 = scmp.lt.u32.totalorder %s1961_s16, %s2381_s8 }
 0x32a   : > { %p1963_p9 = pnand %p1962_p7, %p2447_p10 }
 0x32b   : > { %p1968_p4 = por %p1967_p2, %p1966_p0 }
 0x32c   : > { %p1964_p12 = pneg %p1963_p9 }
 0x32d   : > { %p1970_p11 = por %p1969_p8, %p1968_p4 }
 0x32f   : > { %p1971_p13 = pnand %p1970_p11, %p1964_p12 }
 0x331   : > { %1974 = shalt.err (!%p1971_p13)
}
 0x332   : > { %1844 = dma.vmem_to_hbm [thread:$0]  (%p2447_p10), %s2383_s23, 128, %s2381_s8, %s1601_s27  }
 0x333 PF: > { %p1856_p1 = scmp.ge.s32.totalorder %s2029_s29, 2  ;;  %s1627_s30 = sand.u32 1, %s2009_s24  }
 0x334   : > { %p2448_p3 = scmp.ne.s32.totalorder %s2441_s13, 0  ;;  %s1628_s19 = scalar_lea.sflag [#allocation4], %s1627_s30 }
 0x336   : > { %p1851_p5 = pnand %p1856_p1, %p2448_p3 }
 0x338   : > { %2004 = dma.done.wait (!%p1851_p5), %s1628_s19, 128  }
 0x339   : > { %2006 = vsyncadd (!%p1851_p5), %s1628_s19, 4294967168  ;;  %s21_s29 = sadd.s32 1, %s2029_s29   ;;  %s2449_s24 = smov %s2013_s25 }
 0x33a   : > { %p18_p6 = scmp.ge.s32.totalorder %s21_s29, 4   ;;  %s2450_s25 = smov %s2017_s26 }
 0x33b   : > { %s2451_s26 = smov %s2130_s14  ;;  %s2452_s27 = smov %s2025_s28 }
 0x33c   : > { %s2453_s28 = smov %s2455_s9  ;;  %20 = sbr.rel (!%p18_p6) target bundleno = 5 (0x5), region = 96 }
 0x343   :  { %1633 = vsyncpa [#allocation3], 1 }
 0x344   :  { %1635 = vsyncpa [#allocation3 + $0x1], 1 }
 0x345   :  { %1636 = vsyncpa [#allocation4], 1 }
 0x346   :  { %1638 = vsyncpa [#allocation4 + $0x1], 1 }

</bundles_post_ra>
